<compile_context>
chip_gen: v7x
topology: tpu7x:2x2x1
jax: 0.10.0
libtpu: 0.0.40
codegen_flags: <defaults>
</compile_context>

<pallas_src>
import numpy as np
import jax
import jax.numpy as jnp
from jax.experimental import pallas as pl
from jax.experimental.pallas import tpu as pltpu


# ----------------------------- Pallas kernel --------------------------------

def _timestep_embed_kernel(ts_ref, pe_ref, w1_ref, b1_ref, w2_ref, b2_ref, o_ref):
    """One fused grid step: pe-row gather + Linear -> SiLU -> Linear.

    ts_ref : (TB, 1)  int32 timesteps for this batch tile
    pe_ref : (L, D)   positional-encoding table (bf16, VMEM resident, 1-buffered)
    w1_ref : (D, D)   first Linear weight, stored (in, out) (bf16, resident)
    b1_ref : (1, D)   first Linear bias  (f32, resident)
    w2_ref : (D, D)   second Linear weight (bf16, resident)
    b2_ref : (1, D)   second Linear bias (f32, resident)
    o_ref  : (TB, D)  lane-dense f32 output slab
    """
    L = pe_ref.shape[0]
    ts = ts_ref[...]                                            # (TB, 1) int32
    tb = ts.shape[0]

    # PyTorch-style indexing: wrap negatives; clamp instead of silently
    # producing an all-zero one-hot row for out-of-range timesteps.
    ts = jnp.where(ts < 0, ts + L, ts)
    ts = jnp.clip(ts, 0, L - 1)

    # Gather pe rows via a one-hot (TB, L) @ (L, D) MXU pass. Exact: 0/1 x bf16
    # products accumulated in f32 reproduce the stored bf16 rows bit-for-bit.
    iota = jax.lax.broadcasted_iota(jnp.int32, (tb, L), 1)      # (TB, L)
    onehot = (iota == ts).astype(pe_ref.dtype)                  # (TB, L)
    x = jnp.dot(onehot, pe_ref[...],
                preferred_element_type=jnp.float32)             # (TB, D) f32

    # Linear -> SiLU -> Linear.  MXU inputs in bf16, accumulation + bias add +
    # activation in f32 (SiLU's exp runs on the EUP, a separate issue slot).
    wdt = w1_ref.dtype
    h = jnp.dot(x.astype(wdt), w1_ref[...],
                preferred_element_type=jnp.float32) + b1_ref[...]
    h = h * (1.0 / (1.0 + jnp.exp(-h)))                         # SiLU, f32
    y = jnp.dot(h.astype(wdt), w2_ref[...],
                preferred_element_type=jnp.float32) + b2_ref[...]
    o_ref[...] = y.astype(o_ref.dtype)


def timestep_embedder_pallas(timesteps, pe, w1, b1, w2, b2, *,
                             max_tile_b=256, batch_parallel=False):
    """timesteps: int (B,); pe: (L, D); w1/w2: (D, D) stored (in, out); b1/b2: (1, D).

    Returns f32 (B, D) = Linear(SiLU(Linear(pe[timesteps]))).
    """
    B = timesteps.shape[0]
    L, D = pe.shape

    # Batch tile: multiple of 8 sublanes; a single grid step for small B.
    # Callers with CFG / per-joint duplication should flatten those axes into B
    # before calling so the MXU sees >=128 rows whenever possible.
    tb = int(min(max_tile_b, -(-B // 8) * 8))
    Bp = -(-B // tb) * tb
    num_tiles = Bp // tb

    ts2 = timesteps.astype(jnp.int32).reshape(B, 1)
    if Bp != B:                    # pad only when B is not a tile multiple
        ts2 = jnp.pad(ts2, ((0, Bp - B), (0, 0)))

    itemsize = lambda a: np.dtype(a.dtype).itemsize
    param_bytes = (pe.size * itemsize(pe) + w1.size * itemsize(w1)
                   + w2.size * itemsize(w2)
                   + b1.size * itemsize(b1) + b2.size * itemsize(b2))
    out_bytes = Bp * D * 4
    cost = pl.CostEstimate(
        flops=int(2 * Bp * L * D + 4 * Bp * D * D),
        transcendentals=int(Bp * D),                   # SiLU's exp
        bytes_accessed=int(param_bytes + out_bytes + Bp * 4),
    )

    # Scoped-VMEM budget: single-buffered residents + double-buffered ts/out
    # tiles + in-kernel temporaries; capped at v7x's 64 MiB physical VMEM.
    vmem_needed = (param_bytes
                   + 2 * (tb * 128 * 4 + tb * D * 4)   # ts + out (2 buffers)
                   + tb * L * itemsize(pe) + 4 * tb * D * 4)
    vmem_limit = int(min(64 * 2**20, max(32 * 2**20, 2 * vmem_needed + (2 << 20))))

    single = pl.Buffered(buffer_count=1)   # grid-invariant -> no double buffer

    out = pl.pallas_call(
        _timestep_embed_kernel,
        out_shape=jax.ShapeDtypeStruct((Bp, D), jnp.float32),
        grid_spec=pltpu.PrefetchScalarGridSpec(
            num_scalar_prefetch=0,
            grid=(num_tiles,),
            in_specs=[
                pl.BlockSpec((tb, 1), lambda i: (i, 0)),             # timesteps
                pl.BlockSpec((L, D), lambda i: (0, 0), pipeline_mode=single),
                pl.BlockSpec((D, D), lambda i: (0, 0), pipeline_mode=single),
                pl.BlockSpec((1, D), lambda i: (0, 0), pipeline_mode=single),
                pl.BlockSpec((D, D), lambda i: (0, 0), pipeline_mode=single),
                pl.BlockSpec((1, D), lambda i: (0, 0), pipeline_mode=single),
            ],
            out_specs=pl.BlockSpec((tb, D), lambda i: (i, 0)),
        ),
        compiler_params=pltpu.CompilerParams(
            # "arbitrary" by default: the kernel is weight-DMA bound, so
            # splitting batch tiles across v7x's two TensorCores would
            # duplicate the resident weights/pe for near-zero compute benefit.
            dimension_semantics=(("parallel" if batch_parallel else "arbitrary"),),
            vmem_limit_bytes=vmem_limit,
        ),
        cost_estimate=cost,
    )(ts2, pe, w1, b1, w2, b2)
    return out if Bp == B else out[:B]


# ------------------------------ Module glue ---------------------------------

class TimestepEmbedderPallas:
    """JAX/Pallas port of TimestepEmbedder: pe-row lookup -> Linear -> SiLU -> Linear."""

    def __init__(self, latent_dim, max_len, key, param_dtype=jnp.bfloat16):
        assert latent_dim % 128 == 0, "keep latent_dim lane-dense (multiple of 128)"
        self.latent_dim = latent_dim
        self.max_len = max_len
        D = latent_dim

        # Sinusoidal positional encoding (same formula as MDM's PositionalEncoding).
        position = np.arange(max_len, dtype=np.float64)[:, None]
        div_term = np.exp(np.arange(0, D, 2, dtype=np.float64) * (-np.log(10000.0) / D))
        pe = np.zeros((max_len, D), dtype=np.float64)
        pe[:, 0::2] = np.sin(position * div_term)
        pe[:, 1::2] = np.cos(position * div_term)

        # pe / weights stored MXU-native (bf16 by default): halves per-call
        # weight DMA + VMEM residency.  Biases stay f32 (added in f32).
        self.pe = jnp.asarray(pe, param_dtype)

        # PyTorch-style Linear init: uniform(-1/sqrt(fan_in), 1/sqrt(fan_in)).
        # Stored as (in, out) so the kernel computes x @ W (PyTorch uses x @ W.T).
        keys = jax.random.split(key, 4)
        bound = 1.0 / np.sqrt(D)
        self.w1 = jax.random.uniform(keys[0], (D, D), jnp.float32, -bound, bound).astype(param_dtype)
        self.b1 = jax.random.uniform(keys[1], (1, D), jnp.float32, -bound, bound)
        self.w2 = jax.random.uniform(keys[2], (D, D), jnp.float32, -bound, bound).astype(param_dtype)
        self.b2 = jax.random.uniform(keys[3], (1, D), jnp.float32, -bound, bound)

    def __call__(self, timesteps, **kwargs):
        # timesteps: int (B,)  ->  (1, B, latent_dim), matching permute(1, 0, 2)
        # of the PyTorch (B, 1, D) result; the leading-axis expand is free.
        y = timestep_embedder_pallas(timesteps, self.pe,
                                     self.w1, self.b1, self.w2, self.b2, **kwargs)
        return y[None, :, :]

    # Pure float64 reference using the module's stored parameters.
    def reference(self, timesteps):
        to64 = lambda a: np.asarray(jnp.asarray(a, jnp.float32), dtype=np.float64)
        pe, w1, b1, w2, b2 = map(to64, (self.pe, self.w1, self.b1, self.w2, self.b2))
        x = pe[np.asarray(timesteps)]                     # (B, D)
        h = x @ w1 + b1
        h = h * (1.0 / (1.0 + np.exp(-h)))                # SiLU
        y = h @ w2 + b2
        return y[None, :, :]                              # (1, B, D)


# --------------------------------- Demo --------------------------------------

if __name__ == "__main__":
    key = jax.random.PRNGKey(0)
    key_params, key_t = jax.random.split(key)

    latent_dim = 128          # lane-dense hidden size
    max_len = 64              # positional-encoding table length
    batch = 8                 # one sublane tile of timesteps

    module = TimestepEmbedderPallas(latent_dim, max_len, key_params)
    timesteps = jax.random.randint(key_t, (batch,), 0, max_len, dtype=jnp.int32)

    out = jax.block_until_ready(module(timesteps))

    ref = module.reference(timesteps)
    assert out.shape == (1, batch, latent_dim), out.shape
    np.testing.assert_allclose(np.asarray(out, np.float64), ref, rtol=2e-3, atol=2e-3)

    print("KERNEL_OK")
</pallas_src>

<mosaic_0001>
module attributes {stable_mosaic.version = 11 : i64} {
  func.func @_timestep_embed_kernel(%arg0: i32, %arg1: memref<8x1xi32, #tpu.memory_space<vmem>>, %arg2: memref<64x128xbf16, #tpu.memory_space<vmem>>, %arg3: memref<128x128xbf16, #tpu.memory_space<vmem>>, %arg4: memref<1x128xf32, #tpu.memory_space<vmem>>, %arg5: memref<128x128xbf16, #tpu.memory_space<vmem>>, %arg6: memref<1x128xf32, #tpu.memory_space<vmem>>, %arg7: memref<8x128xf32, #tpu.memory_space<vmem>>) attributes {dimension_semantics = [#tpu.dimension_semantics<arbitrary>], iteration_bounds = array<i64: 1>, scalar_prefetch = 0 : i64, scratch_operands = 0 : i64, tpu.core_type = #tpu.core_type<tc>, window_params = [{transform_indices = @transform_0, window_bounds = array<i64: 8, 1>}, {pipeline_mode = #tpu.pipeline_mode<synchronous>, transform_indices = @transform_1, window_bounds = array<i64: 64, 128>}, {pipeline_mode = #tpu.pipeline_mode<synchronous>, transform_indices = @transform_2, window_bounds = array<i64: 128, 128>}, {pipeline_mode = #tpu.pipeline_mode<synchronous>, transform_indices = @transform_3, window_bounds = array<i64: 1, 128>}, {pipeline_mode = #tpu.pipeline_mode<synchronous>, transform_indices = @transform_4, window_bounds = array<i64: 128, 128>}, {pipeline_mode = #tpu.pipeline_mode<synchronous>, transform_indices = @transform_5, window_bounds = array<i64: 1, 128>}, {transform_indices = @transform_6, window_bounds = array<i64: 8, 128>}]} {
    %c0 = arith.constant 0 : index
    %c0_0 = arith.constant 0 : index
    %0 = vector.load %arg1[%c0, %c0_0] : memref<8x1xi32, #tpu.memory_space<vmem>>, vector<8x1xi32>
    %c0_i32 = arith.constant 0 : i32
    %1 = vector.broadcast %c0_i32 : i32 to vector<8x1xi32>
    %2 = arith.cmpi slt, %0, %1 : vector<8x1xi32>
    %c64_i32 = arith.constant 64 : i32
    %3 = vector.broadcast %c64_i32 : i32 to vector<8x1xi32>
    %4 = arith.addi %0, %3 : vector<8x1xi32>
    %5 = arith.select %2, %4, %0 : vector<8x1xi1>, vector<8x1xi32>
    %c0_i32_1 = arith.constant 0 : i32
    %c63_i32 = arith.constant 63 : i32
    %6 = vector.broadcast %c0_i32_1 : i32 to vector<8x1xi32>
    %7 = arith.maxsi %6, %5 : vector<8x1xi32>
    %8 = vector.broadcast %c63_i32 : i32 to vector<8x1xi32>
    %9 = arith.minsi %8, %7 : vector<8x1xi32>
    %10 = tpu.iota {dimensions = array<i32: 1>} : vector<8x64xi32>
    %11 = vector.broadcast %9 : vector<8x1xi32> to vector<8x64xi32>
    %12 = arith.cmpi eq, %10, %11 : vector<8x64xi32>
    %13 = arith.extui %12 : vector<8x64xi1> to vector<8x64xi32>
    %14 = arith.sitofp %13 : vector<8x64xi32> to vector<8x64xf32>
    %15 = arith.truncf %14 : vector<8x64xf32> to vector<8x64xbf16>
    %c0_2 = arith.constant 0 : index
    %c0_3 = arith.constant 0 : index
    %16 = vector.load %arg2[%c0_2, %c0_3] : memref<64x128xbf16, #tpu.memory_space<vmem>>, vector<64x128xbf16>
    %cst = arith.constant dense<0.000000e+00> : vector<8x128xf32>
    %17 = tpu.matmul %15, %16, %cst {dimension_numbers = #tpu.dot_dimension_numbers<[1], [0], [0], [1], [0, 0, 1, 1], [], []>} : vector<8x64xbf16>, vector<64x128xbf16>, vector<8x128xf32> -> vector<8x128xf32>
    %18 = arith.truncf %17 : vector<8x128xf32> to vector<8x128xbf16>
    %c0_4 = arith.constant 0 : index
    %c0_5 = arith.constant 0 : index
    %19 = vector.load %arg3[%c0_4, %c0_5] : memref<128x128xbf16, #tpu.memory_space<vmem>>, vector<128x128xbf16>
    %cst_6 = arith.constant dense<0.000000e+00> : vector<8x128xf32>
    %20 = tpu.matmul %18, %19, %cst_6 {dimension_numbers = #tpu.dot_dimension_numbers<[1], [0], [0], [1], [0, 0, 1, 1], [], []>} : vector<8x128xbf16>, vector<128x128xbf16>, vector<8x128xf32> -> vector<8x128xf32>
    %c0_7 = arith.constant 0 : index
    %c0_8 = arith.constant 0 : index
    %21 = vector.load %arg4[%c0_7, %c0_8] : memref<1x128xf32, #tpu.memory_space<vmem>>, vector<1x128xf32>
    %22 = vector.broadcast %21 : vector<1x128xf32> to vector<8x128xf32>
    %23 = arith.addf %20, %22 : vector<8x128xf32>
    %cst_9 = arith.constant 0.000000e+00 : f32
    %24 = vector.broadcast %cst_9 : f32 to vector<8x128xf32>
    %25 = arith.subf %24, %23 : vector<8x128xf32>
    %26 = math.exp %25 : vector<8x128xf32>
    %cst_10 = arith.constant 1.000000e+00 : f32
    %27 = vector.broadcast %cst_10 : f32 to vector<8x128xf32>
    %28 = arith.addf %27, %26 : vector<8x128xf32>
    %cst_11 = arith.constant 1.000000e+00 : f32
    %29 = vector.broadcast %cst_11 : f32 to vector<8x128xf32>
    %30 = arith.divf %29, %28 : vector<8x128xf32>
    %31 = arith.mulf %23, %30 : vector<8x128xf32>
    %32 = arith.truncf %31 : vector<8x128xf32> to vector<8x128xbf16>
    %c0_12 = arith.constant 0 : index
    %c0_13 = arith.constant 0 : index
    %33 = vector.load %arg5[%c0_12, %c0_13] : memref<128x128xbf16, #tpu.memory_space<vmem>>, vector<128x128xbf16>
    %cst_14 = arith.constant dense<0.000000e+00> : vector<8x128xf32>
    %34 = tpu.matmul %32, %33, %cst_14 {dimension_numbers = #tpu.dot_dimension_numbers<[1], [0], [0], [1], [0, 0, 1, 1], [], []>} : vector<8x128xbf16>, vector<128x128xbf16>, vector<8x128xf32> -> vector<8x128xf32>
    %c0_15 = arith.constant 0 : index
    %c0_16 = arith.constant 0 : index
    %35 = vector.load %arg6[%c0_15, %c0_16] : memref<1x128xf32, #tpu.memory_space<vmem>>, vector<1x128xf32>
    %36 = vector.broadcast %35 : vector<1x128xf32> to vector<8x128xf32>
    %37 = arith.addf %34, %36 : vector<8x128xf32>
    %c0_17 = arith.constant 0 : index
    %c0_18 = arith.constant 0 : index
    %38 = vector.load %arg7[%c0_17, %c0_18] : memref<8x128xf32, #tpu.memory_space<vmem>>, vector<8x128xf32>
    tpu.vector_store %arg7[%c0_17, %c0_18], %37 {strides = array<i32>} : memref<8x128xf32, #tpu.memory_space<vmem>>, vector<8x128xf32>,
    return
  }
  func.func @transform_0(%arg0: i32) -> (i32, i32) {
    %c0_i32 = arith.constant 0 : i32
    %c0_i32_0 = arith.constant 0 : i32
    return %arg0, %c0_i32 : i32, i32
  }
  func.func @transform_1(%arg0: i32) -> (i32, i32) {
    %c0_i32 = arith.constant 0 : i32
    %c0_i32_0 = arith.constant 0 : i32
    %c0_i32_1 = arith.constant 0 : i32
    return %c0_i32, %c0_i32_0 : i32, i32
  }
  func.func @transform_2(%arg0: i32) -> (i32, i32) {
    %c0_i32 = arith.constant 0 : i32
    %c0_i32_0 = arith.constant 0 : i32
    %c0_i32_1 = arith.constant 0 : i32
    return %c0_i32, %c0_i32_0 : i32, i32
  }
  func.func @transform_3(%arg0: i32) -> (i32, i32) {
    %c0_i32 = arith.constant 0 : i32
    %c0_i32_0 = arith.constant 0 : i32
    %c0_i32_1 = arith.constant 0 : i32
    return %c0_i32, %c0_i32_0 : i32, i32
  }
  func.func @transform_4(%arg0: i32) -> (i32, i32) {
    %c0_i32 = arith.constant 0 : i32
    %c0_i32_0 = arith.constant 0 : i32
    %c0_i32_1 = arith.constant 0 : i32
    return %c0_i32, %c0_i32_0 : i32, i32
  }
  func.func @transform_5(%arg0: i32) -> (i32, i32) {
    %c0_i32 = arith.constant 0 : i32
    %c0_i32_0 = arith.constant 0 : i32
    %c0_i32_1 = arith.constant 0 : i32
    return %c0_i32, %c0_i32_0 : i32, i32
  }
  func.func @transform_6(%arg0: i32) -> (i32, i32) {
    %c0_i32 = arith.constant 0 : i32
    %c0_i32_0 = arith.constant 0 : i32
    return %arg0, %c0_i32 : i32, i32
  }
}

</mosaic_0001>

<bundles_post_ra>
// kernel: tpu_custom_call.1
= control target key start
LH: loop header
LB: loop body
LE: loop exit
PB: predicated region body
PF: predicated region fallthrough
CT: control target
= control target key end

     0   :  { %11 = vsyncpa [#allocation3], 0  ;;  %s778_s0 = inlined_call_operand.vmem [shape: s32[8,1], index: 0, kind: input, shape index: {}]   ;;  %s779_s1 = inlined_call_operand.hbm [shape: bf16[64,128], index: 1, kind: input, shape index: {}]   ;;  %s780_s2 = inlined_call_operand.hbm [shape: bf16[128,128], index: 2, kind: input, shape index: {}]   ;;  %s781_s3 = inlined_call_operand.vmem [shape: f32[1,128], index: 3, kind: input, shape index: {}]   ;;  %s782_s4 = inlined_call_operand.hbm [shape: bf16[128,128], index: 4, kind: input, shape index: {}]   ;;  %s783_s5 = inlined_call_operand.vmem [shape: f32[1,128], index: 5, kind: input, shape index: {}]   ;;  %s784_s6 = inlined_call_operand.hbm [shape: f32[8,128], index: 6, kind: output, shape index: {}]  }
   0x1   :  { %12 = vsyncpa [#allocation6], 0 }
   0x2   :  { %13 = vsyncpa [#allocation4], 0  ;;  %s634_s21 = smov [#allocation5]   ;;  %s635_s23 = smov [#allocation2]  }
   0x3   :  { %s33_s22 = sshll.u32 %s634_s21, 4  ;;  %s21_s24 = sshll.u32 %s635_s23, 4  ;;  %s34_s22 = int_to_ptr.vmem [resolvable:$true] %s33_s22  ;;  %s678_s24 = int_to_ptr.vmem [resolvable:$true] %s21_s24 }
   0x4   :  { %s540_s27 = scalar_lea.hbm %s780_s2, 1024 }
   0x5   :  { %p541_p0 = scmp.ne.s32.totalorder %s780_s2, %s540_s27  ;;  %p544_p1 = scmp.lt.u32.totalorder %s540_s27, %s780_s2 }
   0x7   :  { %p546_p2 = pnand %p544_p1, %p541_p0 }
   0x9   :  { %549 = shalt.err (!%p546_p2)
}
   0xa   :  { %s550_s8 = scalar_lea.vmem %s34_s22, 1024  ;;  %p555_p4 = scmp.lt.s32.totalorder %s34_s22, %s34_s22 }
   0xb   :  { %p551_p3 = scmp.ne.s32.totalorder %s34_s22, %s550_s8  ;;  %p556_p5 = scmp.lt.s32.totalorder %s550_s8, %s550_s8 }
   0xd   :  { %p557_p6 = por %p556_p5, %p555_p4 }
   0xf   :  { %p558_p7 = pnand %p557_p6, %p551_p3 }
  0x11   :  { %561 = shalt.err (!%p558_p7)
}
  0x12   :  { %s636_s9 = smov 64   ;;  %s637_s10 = smov 4  }
  0x13   :  { %39 = dma.hbm_to_vmem [thread:$0]  %s780_s2, 1024, %s34_s22, [#allocation6], %s636_s9, %s636_s9, %s637_s10  }
  0x14   :  { %s562_s15 = scalar_lea.hbm %s779_s1, 512 }
  0x15   :  { %p563_p8 = scmp.ne.s32.totalorder %s779_s1, %s562_s15  ;;  %p566_p9 = scmp.lt.u32.totalorder %s562_s15, %s779_s1 }
  0x17   :  { %p568_p10 = pnand %p566_p9, %p563_p8 }
  0x19   :  { %571 = shalt.err (!%p568_p10)
}
  0x1a   :  { %s572_s20 = scalar_lea.vmem %s678_s24, 512  ;;  %p577_p12 = scmp.lt.s32.totalorder %s678_s24, %s678_s24 }
  0x1b   :  { %p573_p11 = scmp.ne.s32.totalorder %s678_s24, %s572_s20  ;;  %p578_p13 = scmp.lt.s32.totalorder %s572_s20, %s572_s20 }
  0x1d   :  { %p579_p0 = por %p578_p13, %p577_p12 }
  0x1f   :  { %p580_p1 = pnand %p579_p0, %p573_p11 }
  0x21   :  { %583 = shalt.err (!%p580_p1)
}
  0x22   :  { %27 = dma.hbm_to_vmem [thread:$0]  %s779_s1, 512, %s678_s24, [#allocation3], %s636_s9, %s636_s9, %s637_s10  }
  0x23   :  { %s638_s22 = smov [#allocation7]   ;;  %s584_s27 = scalar_lea.hbm %s782_s4, 1024 }
  0x24   :  { %s47_s23 = sshll.u32 %s638_s22, 4  ;;  %p585_p2 = scmp.ne.s32.totalorder %s782_s4, %s584_s27  ;;  %s48_s23 = int_to_ptr.vmem [resolvable:$true] %s47_s23 }
  0x25   :  { %p588_p3 = scmp.lt.u32.totalorder %s584_s27, %s782_s4 }
  0x27   :  { %p590_p4 = pnand %p588_p3, %p585_p2 }
  0x29   :  { %593 = shalt.err (!%p590_p4)
}
  0x2a   :  { %s594_s8 = scalar_lea.vmem %s48_s23, 1024  ;;  %p599_p6 = scmp.lt.s32.totalorder %s48_s23, %s48_s23 }
  0x2b   :  { %p595_p5 = scmp.ne.s32.totalorder %s48_s23, %s594_s8  ;;  %p600_p7 = scmp.lt.s32.totalorder %s594_s8, %s594_s8 }
  0x2d   :  { %p601_p8 = por %p600_p7, %p599_p6 }
  0x2f   :  { %p602_p9 = pnand %p601_p8, %p595_p5 }
  0x31   :  { %605 = shalt.err (!%p602_p9)
}
  0x32   :  { %53 = dma.hbm_to_vmem [thread:$0]  %s782_s4, 1024, %s48_s23, [#allocation6], %s636_s9, %s636_s9, %s637_s10  }
  0x33   :  { %628 = dma.done.wait [#allocation3], 512  }
  0x34   :  { %629 = vsyncadd [#allocation3], 4294966784 }
  0x35   :  { %630 = dma.done.wait [#allocation6], 2048  }
  0x36   :  { %631 = vsyncadd [#allocation6], 4294965248  ;;  %v639_v0 = vmov 0   ;;  %v640_v1 = vmov 0.0   ;;  %v66_v2 = vld [vmem:[%s778_s0] sm:$0xff]  ;;  %v517_v6 = vld [vmem:[#allocation2 + $0x8] sm:$0xff]   ;;  %v74_v18 = vlaneseq }
  0x37   :  { %515 = vset.pattern.permute.xlu0 %v639_v0  ;;  %454 = vmatprep.subr.bf16.mxu0 %v640_v1  ;;  %vm67_vm0 = vcmp.lt.s32.totalorder %v66_v2, 0  ;;  %v68_v3 = vadd.s32 64, %v66_v2  ;;  %v516_v4 = vld [vmem:[#allocation2] sm:$0xff]   ;;  %v518_v9 = vld [vmem:[#allocation2 + $0x10] sm:$0xff]   ;;  %v519_v10 = vld [vmem:[#allocation2 + $0x18] sm:$0xff]   ;;  %vm641_vm3 = vmmov 0  }
  0x38   :  { %466 = vmatprep.subr.bf16.mxu1 %v640_v1  ;;  %455 = vmatpush3.bf16.msra.mxu0 %v516_v4  ;;  %v520_v11 = vld [vmem:[#allocation5] sm:$0xff]   ;;  %v521_v12 = vld [vmem:[#allocation5 + $0x8] sm:$0xff]   ;;  %v522_v13 = vld [vmem:[#allocation5 + $0x10] sm:$0xff]   ;;  %v75_v19 = vand.u32 127, %v74_v18  ;;  %vm115_vm5 = vcmask 523264  }
  0x39   :  { %v69_v5 = vsel %vm67_vm0, %v68_v3, %v66_v2  ;;  %456 = vmatprep.subr.bf16.mxu0 %v640_v1  ;;  %462 = vmatprep.mubr.msk.bf16.mxu0 %vm641_vm3, %v640_v1  ;;  %v523_v14 = vld [vmem:[#allocation5 + $0x18] sm:$0xff]   ;;  %v524_v15 = vld [vmem:[#allocation5 + $0x20] sm:$0xff]   ;;  %v525_v16 = vld [vmem:[#allocation5 + $0x28] sm:$0xff]  }
  0x3a   :  { %vm70_vm1 = vcmp.gt.s32.totalorder %v69_v5, 0  ;;  %482 = vmatprep.mubr.msk.bf16.mxu1 %vm641_vm3, %v640_v1  ;;  %467 = vmatpush3.bf16.msra.mxu1 %v520_v11  ;;  %v526_v17 = vld [vmem:[#allocation5 + $0x30] sm:$0xff]   ;;  %v527_v23 = vld [vmem:[#allocation5 + $0x38] sm:$0xff]   ;;  %v528_v29 = vld [vmem:[#allocation7] sm:$0xff]  }
  0x3b   :  { %v71_v7 = vsel %vm70_vm1, %v69_v5, 0  ;;  %468 = vmatprep.subr.bf16.mxu1 %v640_v1  ;;  %v529_v30 = vld [vmem:[#allocation7 + $0x8] sm:$0xff]   ;;  %v530_v31 = vld [vmem:[#allocation7 + $0x10] sm:$0xff]   ;;  %v531_v32 = vld [vmem:[#allocation7 + $0x18] sm:$0xff]  }
  0x3c   :  { %vm72_vm2 = vcmp.lt.s32.totalorder %v71_v7, 63  ;;  %457 = vmatpush3.bf16.msra.mxu0 %v517_v6  ;;  %v532_v33 = vld [vmem:[#allocation7 + $0x20] sm:$0xff]   ;;  %v533_v34 = vld [vmem:[#allocation7 + $0x28] sm:$0xff]   ;;  %v534_v35 = vld [vmem:[#allocation7 + $0x30] sm:$0xff]  }
  0x3d   :  { %v73_v8 = vsel %vm72_vm2, %v71_v7, 63  ;;  %458 = vmatprep.subr.bf16.mxu0 %v640_v1  ;;  %v535_v36 = vld [vmem:[#allocation7 + $0x38] sm:$0xff]   ;;  %v413_v37 = vld [vmem:[%s781_s3] ss:$0 sm:$0xff]  ;;  %s642_s3 = smov [#allocation8]  }
  0x3e   :  { %77 = vperm.xlu0 %515, %v73_v8   ;;  %469 = vmatpush3.bf16.msra.mxu1 %v521_v12  ;;  %v422_v50 = vld [vmem:[%s783_s5] ss:$0 sm:$0xff]  ;;  %s397_s13 = sshll.u32 %s642_s3, 4  ;;  %s398_s13 = int_to_ptr.vmem [resolvable:$true] %s397_s13 }
  0x3f   :  { %470 = vmatprep.subr.bf16.mxu1 %v640_v1  ;;  %s606_s14 = scalar_lea.vmem %s398_s13, 128  ;;  %p611_p11 = scmp.lt.s32.totalorder %s398_s13, %s398_s13 }
  0x40   :  { %459 = vmatpush3.bf16.msra.mxu0 %v518_v9  ;;  %p607_p10 = scmp.ne.s32.totalorder %s398_s13, %s606_s14  ;;  %p612_p12 = scmp.lt.s32.totalorder %s606_s14, %s606_s14 }
  0x41   :  { %460 = vmatprep.subr.bf16.mxu0 %v640_v1 }
  0x42   :  { %471 = vmatpush3.bf16.msra.mxu1 %v522_v13  ;;  %p613_p13 = por %p612_p12, %p611_p11 }
  0x43   :  { %472 = vmatprep.subr.bf16.mxu1 %v640_v1 }
  0x44   :  { %461 = vmatpush3.bf16.msra.mxu0 %v519_v10  ;;  %p614_p0 = pnand %p613_p13, %p607_p10 }
  0x45   :  { %486 = vmatprep.subr.bf16.mxu0 %v640_v1 }
  0x46   :  { %473 = vmatpush3.bf16.msra.mxu1 %v523_v14 }
  0x47   :  { %474 = vmatprep.subr.bf16.mxu1 %v640_v1 }
  0x4a   :  { %475 = vmatpush3.bf16.msra.mxu1 %v524_v15 }
  0x4b   :  { %476 = vmatprep.subr.bf16.mxu1 %v640_v1 }
  0x4e   :  { %477 = vmatpush3.bf16.msra.mxu1 %v525_v16 }
  0x4f   :  { %478 = vmatprep.subr.bf16.mxu1 %v640_v1 }
  0x52   :  { %479 = vmatpush3.bf16.msra.mxu1 %v526_v17 }
  0x53   :  { %480 = vmatprep.subr.bf16.mxu1 %v640_v1 }
  0x56   :  { %481 = vmatpush3.bf16.msra.mxu1 %v527_v23 }
  0xbd   :  { %v78_v20 = vpop.permute.xlu0 %77 }
  0xbe   :  { %vm79_vm4 = vcmp.eq.s32.totalorder %v75_v19, %v78_v20 }
  0xbf   :  { %v407_v21 = vsel %vm79_vm4, 1.0, %v640_v1 }
  0xc0   :  { %v82_v22 = vpack.c.bf16 %v407_v21, %v407_v21 }
  0xc2   :  { %463 = vmatmul.mubr.msk.bf16.vlgmr.msra.gmra.mrb[0].mxu0 %vm115_vm5, %v82_v22 }
  0xc3   :  { %502 = vmatprep.mubr.msk.bf16.mxu0 %vm641_vm3, %v640_v1  ;;  %487 = vmatpush3.bf16.msra.mxu0 %v528_v29 }
  0xc4   :  { %488 = vmatprep.subr.bf16.mxu0 %v640_v1 }
  0xc7   :  { %489 = vmatpush3.bf16.msra.mxu0 %v529_v30 }
  0xc8   :  { %490 = vmatprep.subr.bf16.mxu0 %v640_v1 }
  0xcb   :  { %491 = vmatpush3.bf16.msra.mxu0 %v530_v31 }
  0xcc   :  { %492 = vmatprep.subr.bf16.mxu0 %v640_v1 }
  0xcf   :  { %493 = vmatpush3.bf16.msra.mxu0 %v531_v32 }
  0xd0   :  { %494 = vmatprep.subr.bf16.mxu0 %v640_v1 }
  0xd3   :  { %495 = vmatpush3.bf16.msra.mxu0 %v532_v33 }
  0xd4   :  { %496 = vmatprep.subr.bf16.mxu0 %v640_v1 }
  0xd7   :  { %497 = vmatpush3.bf16.msra.mxu0 %v533_v34 }
  0xd8   :  { %498 = vmatprep.subr.bf16.mxu0 %v640_v1 }
  0xdb   :  { %499 = vmatpush3.bf16.msra.mxu0 %v534_v35 }
  0xdc   :  { %500 = vmatprep.subr.bf16.mxu0 %v640_v1 }
  0xdf   :  { %501 = vmatpush3.bf16.msra.mxu0 %v535_v36 }
 0x195   :  { %v153_v24 = vpop.f32.mrb[0].mxu0 }
 0x196   :  { %v159_v25 = vpack.c.bf16 %v153_v24, %v153_v24  ;;  %v464_v26 = vpop.f32.mrb[1].mxu0 }
 0x197   :  { %v156_v27 = vpop.f32.mrb[2].mxu0 }
 0x198   :  { %v465_v28 = vpop.f32.mrb[3].mxu0  ;;  %483 = vmatmul.mubr.bf16.vlgmr.msra.gmra.mrb[0].mxu1 %v159_v25 }
 0x26b   :  { %v265_v38 = vpop.f32.mrb[0].mxu1 }
 0x26c   :  { %v266_v39 = vadd.f32 %v413_v37, %v265_v38  ;;  %v484_v40 = vpop.f32.mrb[1].mxu1 }
 0x26d   :  { %v268_v41 = vpop.f32.mrb[2].mxu1 }
 0x26e   :  { %v271_v42 = vsub.f32 0.0, %v266_v39  ;;  %v485_v43 = vpop.f32.mrb[3].mxu1 }
 0x270   :  { %v272_v44 = vmul.f32 1.442695, %v271_v42 }
 0x272   :  { %536 = vpow2.f32 %v272_v44 }
 0x27c   :  { %v537_v45 = vpop.eup %536 }
 0x27d   :  { %v274_v46 = vadd.f32 1.0, %v537_v45 }
 0x27f   :  { %538 = vrcp.f32 %v274_v46 }
 0x289   :  { %v539_v47 = vpop.eup %538 }
 0x28a   :  { %v277_v48 = vmul.f32 %v539_v47, %v266_v39 }
 0x28c   :  { %v278_v49 = vpack.c.bf16 %v277_v48, %v277_v48 }
 0x28e   :  { %503 = vmatmul.mubr.bf16.vlgmr.msra.gmra.mrb[4].mxu0 %v278_v49 }
 0x361   :  { %v384_v51 = vpop.f32.mrb[4].mxu0 }
 0x362   :  { %v385_v52 = vadd.f32 %v422_v50, %v384_v51  ;;  %v504_v53 = vpop.f32.mrb[5].mxu0 }
 0x363   :  { %v387_v54 = vpop.f32.mrb[6].mxu0 }
 0x364   :  { %390 = vst [vmem:[#allocation8] sm:$0xff] %v385_v52  ;;  %v505_v55 = vpop.f32.mrb[7].mxu0 }
 0x365   :  { %617 = shalt.err (!%p614_p0)
}
 0x366   :  { %s618_s5 = scalar_lea.hbm %s784_s6, 128 }
 0x367   :  { %p619_p1 = scmp.ne.s32.totalorder %s784_s6, %s618_s5  ;;  %p622_p2 = scmp.lt.u32.totalorder %s618_s5, %s784_s6 }
 0x369   :  { %p624_p3 = pnand %p622_p2, %p619_p1 }
 0x36b   :  { %627 = shalt.err (!%p624_p3)
}
 0x36c   :  { %400 = dma.vmem_to_hbm [thread:$0]  %s398_s13, 128, %s784_s6, [#allocation4]  }
 0x36d   :  { %632 = dma.done.wait [#allocation4], 128  }
 0x36e   :  { %633 = vsyncadd [#allocation4], 4294967168 }
 0x36f   :  { %404 = vsyncpa [#allocation3], 1 }
 0x370   :  { %405 = vsyncpa [#allocation6], 1 }
 0x371   :  { %406 = vsyncpa [#allocation4], 1 }

</bundles_post_ra>
